<compile_context>
chip_gen: v6e
topology: v6e:2x2x1
jax: 0.10.0
libtpu: 0.0.40
codegen_flags: <defaults>
</compile_context>

<pallas_src>
import math
import jax
import jax.numpy as jnp
from jax.experimental import pallas as pl
from jax.experimental.pallas import tpu as pltpu


def _round_up(x, m):
    return ((x + m - 1) // m) * m


def _make_kernel(num_layers, use_f):
    """Build the fused-MLP kernel body for a given (static) config."""

    def kernel(*refs):
        x_ref = refs[0]
        sigma_refs = refs[1:1 + num_layers]
        idx = 1 + num_layers
        wo_ref, bo_ref = refs[idx], refs[idx + 1]
        idx += 2
        if use_f:
            wf_ref, bf_ref, wf2_ref, bf2_ref = refs[idx:idx + 4]
            idx += 4
        v_ref, f_ref = refs[idx], refs[idx + 1]

        # sigma net: Linear(bias=False) + ReLU, all in VMEM / vregs.
        h = x_ref[...]
        for w_ref in sigma_refs:
            h = jnp.dot(h, w_ref[...], preferred_element_type=jnp.float32)
            h = jnp.maximum(h, 0.0)

        # v = out(h)
        v = jnp.dot(h, wo_ref[...], preferred_element_type=jnp.float32) + bo_ref[...]
        v_ref[...] = v.astype(v_ref.dtype)

        if use_f:
            f = jnp.dot(h, wf_ref[...], preferred_element_type=jnp.float32) + bf_ref[...]
            f = jnp.maximum(f, 0.0)
            f = jnp.dot(f, wf2_ref[...], preferred_element_type=jnp.float32) + bf2_ref[...]
            f_ref[...] = f.astype(f_ref.dtype)
        else:
            # f = v * 0 (faithful to torch: propagates NaN/Inf from v).
            f_ref[...] = (v * 0.0).astype(f_ref.dtype)

    return kernel


def nerf_small_potential(x, params, *, tm=1024):
    """Fused forward of NeRFSmallPotential.

    x: (M, input_ch) float32
    params: dict with
        'sigma' : list of num_layers weights, stored transposed as (in_dim, hidden)
        'w_out' : (hidden, 3), 'b_out': (3,)
        optionally 'w_f': (hidden, hidden), 'b_f': (hidden,),
                   'w_f2': (hidden, 3),    'b_f2': (3,)
    returns (v, f), each (M, 3).
    """
    M, in_ch = x.shape
    sigma = params["sigma"]
    num_layers = len(sigma)
    use_f = "w_f" in params
    hidden = sigma[-1].shape[1]
    out_dim = params["w_out"].shape[1]

    # Row tile: large to amortize per-grid-step overhead, shrunk for tiny batches,
    # always a multiple of 8 (sublane constraint).
    tm = _round_up(max(8, min(tm, _round_up(M, 8))), 8)
    Mp = _round_up(M, tm)
    if Mp != M:
        x = jnp.pad(x, ((0, Mp - M), (0, 0)))

    weight_inputs = list(sigma) + [params["w_out"],
                                   params["b_out"].reshape(1, out_dim)]
    if use_f:
        weight_inputs += [params["w_f"], params["b_f"].reshape(1, hidden),
                          params["w_f2"], params["b_f2"].reshape(1, out_dim)]

    # Small full-array weights: constant index map -> resident in VMEM, DMA'd once.
    weight_specs = [pl.BlockSpec(w.shape, lambda i: (0, 0)) for w in weight_inputs]
    in_specs = [pl.BlockSpec((tm, in_ch), lambda i: (i, 0))] + weight_specs
    out_specs = (pl.BlockSpec((tm, out_dim), lambda i: (i, 0)),
                 pl.BlockSpec((tm, out_dim), lambda i: (i, 0)))

    kernel = _make_kernel(num_layers, use_f)

    v, f = pl.pallas_call(
        kernel,
        out_shape=(jax.ShapeDtypeStruct((Mp, out_dim), x.dtype),
                   jax.ShapeDtypeStruct((Mp, out_dim), x.dtype)),
        grid_spec=pltpu.PrefetchScalarGridSpec(
            num_scalar_prefetch=0,
            grid=(Mp // tm,),
            in_specs=in_specs,
            out_specs=out_specs,
        ),
        compiler_params=pltpu.CompilerParams(
            dimension_semantics=("parallel",),
        ),
    )(x, *weight_inputs)

    return v[:M], f[:M]


def init_params(key, num_layers=3, hidden_dim=64, input_ch=3, use_f=False):
    """Deterministic init matching nn.Linear defaults: U(-1/sqrt(in), 1/sqrt(in))
    for both weight and bias. Weights are kept transposed as (in, out)."""
    keys = jax.random.split(key, num_layers + 6)
    params = {}
    sigma = []
    for l in range(num_layers):
        in_dim = input_ch if l == 0 else hidden_dim
        lim = 1.0 / math.sqrt(in_dim)
        w = jax.random.uniform(keys[l], (in_dim, hidden_dim),
                               minval=-lim, maxval=lim, dtype=jnp.float32)
        sigma.append(w)
    params["sigma"] = sigma

    lim = 1.0 / math.sqrt(hidden_dim)
    params["w_out"] = jax.random.uniform(keys[num_layers], (hidden_dim, 3),
                                         minval=-lim, maxval=lim, dtype=jnp.float32)
    params["b_out"] = jax.random.uniform(keys[num_layers + 1], (3,),
                                         minval=-lim, maxval=lim, dtype=jnp.float32)
    if use_f:
        params["w_f"] = jax.random.uniform(keys[num_layers + 2], (hidden_dim, hidden_dim),
                                           minval=-lim, maxval=lim, dtype=jnp.float32)
        params["b_f"] = jax.random.uniform(keys[num_layers + 3], (hidden_dim,),
                                           minval=-lim, maxval=lim, dtype=jnp.float32)
        params["w_f2"] = jax.random.uniform(keys[num_layers + 4], (hidden_dim, 3),
                                            minval=-lim, maxval=lim, dtype=jnp.float32)
        params["b_f2"] = jax.random.uniform(keys[num_layers + 5], (3,),
                                            minval=-lim, maxval=lim, dtype=jnp.float32)
    return params


def nerf_ref(x, params):
    """Pure-JAX reference with identical semantics."""
    h = x
    for w in params["sigma"]:
        h = jnp.maximum(h @ w, 0.0)
    v = h @ params["w_out"] + params["b_out"]
    if "w_f" in params:
        f = jnp.maximum(h @ params["w_f"] + params["b_f"], 0.0)
        f = f @ params["w_f2"] + params["b_f2"]
    else:
        f = v * 0.0
    return v, f


if __name__ == "__main__":
    key = jax.random.PRNGKey(0)
    k_x, k_p, k_pf = jax.random.split(key, 3)

    # Small shapes consistent with the module defaults:
    # input_ch=3, hidden_dim=64, num_layers=3; batch=250 (non-multiple, exercises padding).
    batch, input_ch, hidden_dim, num_layers = 250, 3, 64, 3
    x = jax.random.normal(k_x, (batch, input_ch), dtype=jnp.float32)

    # use_f=False (module default): f == v * 0
    params = init_params(k_p, num_layers=num_layers, hidden_dim=hidden_dim,
                         input_ch=input_ch, use_f=False)
    v, f = nerf_small_potential(x, params, tm=128)   # small tm for the small test batch
    v, f = jax.block_until_ready((v, f))
    v_ref, f_ref = nerf_ref(x, params)
    assert v.shape == (batch, 3) and f.shape == (batch, 3)
    assert jnp.allclose(v, v_ref, atol=1e-5, rtol=1e-5)
    assert jnp.allclose(f, f_ref, atol=1e-5, rtol=1e-5)

    # use_f=True branch
    params_f = init_params(k_pf, num_layers=num_layers, hidden_dim=hidden_dim,
                           input_ch=input_ch, use_f=True)
    v2, f2 = nerf_small_potential(x, params_f, tm=128)
    v2, f2 = jax.block_until_ready((v2, f2))
    v2_ref, f2_ref = nerf_ref(x, params_f)
    assert jnp.allclose(v2, v2_ref, atol=1e-5, rtol=1e-5)
    assert jnp.allclose(f2, f2_ref, atol=1e-5, rtol=1e-5)

    # Exercise the default (large) tile path on a bigger, non-aligned batch as well.
    xb = jax.random.normal(k_x, (5000, input_ch), dtype=jnp.float32)
    v3, f3 = jax.block_until_ready(nerf_small_potential(xb, params_f))
    v3_ref, f3_ref = nerf_ref(xb, params_f)
    assert jnp.allclose(v3, v3_ref, atol=1e-5, rtol=1e-5)
    assert jnp.allclose(f3, f3_ref, atol=1e-5, rtol=1e-5)

    print("KERNEL_OK")
</pallas_src>

<mosaic_0001>
module attributes {stable_mosaic.version = 11 : i64} {
  func.func @kernel(%arg0: i32, %arg1: memref<128x3xf32, #tpu.memory_space<vmem>>, %arg2: memref<3x64xf32, #tpu.memory_space<vmem>>, %arg3: memref<64x64xf32, #tpu.memory_space<vmem>>, %arg4: memref<64x64xf32, #tpu.memory_space<vmem>>, %arg5: memref<64x3xf32, #tpu.memory_space<vmem>>, %arg6: memref<1x3xf32, #tpu.memory_space<vmem>>, %arg7: memref<128x3xf32, #tpu.memory_space<vmem>>, %arg8: memref<128x3xf32, #tpu.memory_space<vmem>>) attributes {dimension_semantics = [#tpu.dimension_semantics<parallel>], iteration_bounds = array<i64: 2>, scalar_prefetch = 0 : i64, scratch_operands = 0 : i64, tpu.core_type = #tpu.core_type<tc>, window_params = [{transform_indices = @transform_0, window_bounds = array<i64: 128, 3>}, {pipeline_mode = #tpu.pipeline_mode<synchronous>, transform_indices = @transform_1, window_bounds = array<i64: 3, 64>}, {pipeline_mode = #tpu.pipeline_mode<synchronous>, transform_indices = @transform_2, window_bounds = array<i64: 64, 64>}, {pipeline_mode = #tpu.pipeline_mode<synchronous>, transform_indices = @transform_3, window_bounds = array<i64: 64, 64>}, {pipeline_mode = #tpu.pipeline_mode<synchronous>, transform_indices = @transform_4, window_bounds = array<i64: 64, 3>}, {pipeline_mode = #tpu.pipeline_mode<synchronous>, transform_indices = @transform_5, window_bounds = array<i64: 1, 3>}, {transform_indices = @transform_6, window_bounds = array<i64: 128, 3>}, {transform_indices = @transform_7, window_bounds = array<i64: 128, 3>}]} {
    %c0 = arith.constant 0 : index
    %c0_0 = arith.constant 0 : index
    %0 = vector.load %arg1[%c0, %c0_0] : memref<128x3xf32, #tpu.memory_space<vmem>>, vector<128x3xf32>
    %c0_1 = arith.constant 0 : index
    %c0_2 = arith.constant 0 : index
    %1 = vector.load %arg2[%c0_1, %c0_2] : memref<3x64xf32, #tpu.memory_space<vmem>>, vector<3x64xf32>
    %cst = arith.constant dense<0.000000e+00> : vector<128x64xf32>
    %2 = tpu.matmul %0, %1, %cst {dimension_numbers = #tpu.dot_dimension_numbers<[1], [0], [0], [1], [0, 0, 1, 1], [], []>} : vector<128x3xf32>, vector<3x64xf32>, vector<128x64xf32> -> vector<128x64xf32>
    %cst_3 = arith.constant 0.000000e+00 : f32
    %3 = vector.broadcast %cst_3 : f32 to vector<128x64xf32>
    %4 = arith.maximumf %2, %3 : vector<128x64xf32>
    %c0_4 = arith.constant 0 : index
    %c0_5 = arith.constant 0 : index
    %5 = vector.load %arg3[%c0_4, %c0_5] : memref<64x64xf32, #tpu.memory_space<vmem>>, vector<64x64xf32>
    %cst_6 = arith.constant dense<0.000000e+00> : vector<128x64xf32>
    %6 = tpu.matmul %4, %5, %cst_6 {dimension_numbers = #tpu.dot_dimension_numbers<[1], [0], [0], [1], [0, 0, 1, 1], [], []>} : vector<128x64xf32>, vector<64x64xf32>, vector<128x64xf32> -> vector<128x64xf32>
    %cst_7 = arith.constant 0.000000e+00 : f32
    %7 = vector.broadcast %cst_7 : f32 to vector<128x64xf32>
    %8 = arith.maximumf %6, %7 : vector<128x64xf32>
    %c0_8 = arith.constant 0 : index
    %c0_9 = arith.constant 0 : index
    %9 = vector.load %arg4[%c0_8, %c0_9] : memref<64x64xf32, #tpu.memory_space<vmem>>, vector<64x64xf32>
    %cst_10 = arith.constant dense<0.000000e+00> : vector<128x64xf32>
    %10 = tpu.matmul %8, %9, %cst_10 {dimension_numbers = #tpu.dot_dimension_numbers<[1], [0], [0], [1], [0, 0, 1, 1], [], []>} : vector<128x64xf32>, vector<64x64xf32>, vector<128x64xf32> -> vector<128x64xf32>
    %cst_11 = arith.constant 0.000000e+00 : f32
    %11 = vector.broadcast %cst_11 : f32 to vector<128x64xf32>
    %12 = arith.maximumf %10, %11 : vector<128x64xf32>
    %c0_12 = arith.constant 0 : index
    %c0_13 = arith.constant 0 : index
    %13 = vector.load %arg5[%c0_12, %c0_13] : memref<64x3xf32, #tpu.memory_space<vmem>>, vector<64x3xf32>
    %cst_14 = arith.constant dense<0.000000e+00> : vector<128x3xf32>
    %14 = tpu.matmul %12, %13, %cst_14 {dimension_numbers = #tpu.dot_dimension_numbers<[1], [0], [0], [1], [0, 0, 1, 1], [], []>} : vector<128x64xf32>, vector<64x3xf32>, vector<128x3xf32> -> vector<128x3xf32>
    %c0_15 = arith.constant 0 : index
    %c0_16 = arith.constant 0 : index
    %15 = vector.load %arg6[%c0_15, %c0_16] : memref<1x3xf32, #tpu.memory_space<vmem>>, vector<1x3xf32>
    %16 = vector.broadcast %15 : vector<1x3xf32> to vector<128x3xf32>
    %17 = arith.addf %14, %16 : vector<128x3xf32>
    %c0_17 = arith.constant 0 : index
    %c0_18 = arith.constant 0 : index
    %18 = vector.load %arg7[%c0_17, %c0_18] : memref<128x3xf32, #tpu.memory_space<vmem>>, vector<128x3xf32>
    tpu.vector_store %arg7[%c0_17, %c0_18], %17 {strides = array<i32>} : memref<128x3xf32, #tpu.memory_space<vmem>>, vector<128x3xf32>,
    %cst_19 = arith.constant 0.000000e+00 : f32
    %19 = vector.broadcast %cst_19 : f32 to vector<128x3xf32>
    %20 = arith.mulf %17, %19 : vector<128x3xf32>
    %c0_20 = arith.constant 0 : index
    %c0_21 = arith.constant 0 : index
    %21 = vector.load %arg8[%c0_20, %c0_21] : memref<128x3xf32, #tpu.memory_space<vmem>>, vector<128x3xf32>
    tpu.vector_store %arg8[%c0_20, %c0_21], %20 {strides = array<i32>} : memref<128x3xf32, #tpu.memory_space<vmem>>, vector<128x3xf32>,
    return
  }
  func.func @transform_0(%arg0: i32) -> (i32, i32) {
    %c0_i32 = arith.constant 0 : i32
    %c0_i32_0 = arith.constant 0 : i32
    return %arg0, %c0_i32 : i32, i32
  }
  func.func @transform_1(%arg0: i32) -> (i32, i32) {
    %c0_i32 = arith.constant 0 : i32
    %c0_i32_0 = arith.constant 0 : i32
    %c0_i32_1 = arith.constant 0 : i32
    return %c0_i32, %c0_i32_0 : i32, i32
  }
  func.func @transform_2(%arg0: i32) -> (i32, i32) {
    %c0_i32 = arith.constant 0 : i32
    %c0_i32_0 = arith.constant 0 : i32
    %c0_i32_1 = arith.constant 0 : i32
    return %c0_i32, %c0_i32_0 : i32, i32
  }
  func.func @transform_3(%arg0: i32) -> (i32, i32) {
    %c0_i32 = arith.constant 0 : i32
    %c0_i32_0 = arith.constant 0 : i32
    %c0_i32_1 = arith.constant 0 : i32
    return %c0_i32, %c0_i32_0 : i32, i32
  }
  func.func @transform_4(%arg0: i32) -> (i32, i32) {
    %c0_i32 = arith.constant 0 : i32
    %c0_i32_0 = arith.constant 0 : i32
    %c0_i32_1 = arith.constant 0 : i32
    return %c0_i32, %c0_i32_0 : i32, i32
  }
  func.func @transform_5(%arg0: i32) -> (i32, i32) {
    %c0_i32 = arith.constant 0 : i32
    %c0_i32_0 = arith.constant 0 : i32
    %c0_i32_1 = arith.constant 0 : i32
    return %c0_i32, %c0_i32_0 : i32, i32
  }
  func.func @transform_6(%arg0: i32) -> (i32, i32) {
    %c0_i32 = arith.constant 0 : i32
    %c0_i32_0 = arith.constant 0 : i32
    return %arg0, %c0_i32 : i32, i32
  }
  func.func @transform_7(%arg0: i32) -> (i32, i32) {
    %c0_i32 = arith.constant 0 : i32
    %c0_i32_0 = arith.constant 0 : i32
    return %arg0, %c0_i32 : i32, i32
  }
}

</mosaic_0001>

<bundles_post_ra>
// kernel: tpu_custom_call.1
= control target key start
LH: loop header
LB: loop body
LE: loop exit
PB: predicated region body
PF: predicated region fallthrough
CT: control target
= control target key end

     0   :  { %s1694_s24 = smov 0   ;;  %s1965_s0 = inlined_call_operand.vmem [shape: f32[256,3], index: 0, kind: input, shape index: {}]   ;;  %s1966_s1 = inlined_call_operand.vmem [shape: f32[3,64], index: 1, kind: input, shape index: {}]   ;;  %s1967_s2 = inlined_call_operand.vmem [shape: f32[64,64], index: 2, kind: input, shape index: {}]   ;;  %s1968_s3 = inlined_call_operand.vmem [shape: f32[64,64], index: 3, kind: input, shape index: {}]   ;;  %s1969_s4 = inlined_call_operand.vmem [shape: f32[64,3], index: 4, kind: input, shape index: {}]   ;;  %s1970_s5 = inlined_call_operand.vmem [shape: f32[1,3], index: 5, kind: input, shape index: {}]   ;;  %s1971_s6 = inlined_call_operand.vmem [shape: f32[256,3], index: 6, kind: output, shape index: {0}]   ;;  %s1972_s7 = inlined_call_operand.vmem [shape: f32[256,3], index: 7, kind: output, shape index: {1}]  }
   0x1 LB: > { %s1308_s25 = sadd.s32 4294967295, %s1652_s24   ;;  %p1312_p0 = scmp.ge.s32.totalorder %s1652_s24, 1  ;;  %s1652_s24 = sphi %s1694_s24, %s18_s24  }
   0x2   : > { %p241_p1 = scmp.lt.s32.totalorder %s1652_s24, 3 }
   0x4   : > { %p242_p2 = pnand %p1312_p0, %p241_p1 }
   0x5   : > { %s1313_s28 = sshll.u32 (!%p242_p2), %s1308_s25, 4 }
   0x6   : > { %245 = sbr.rel (%p242_p2) target bundleno = 838 (0x346), region = 44  ;;  %p279_p3 = scmp.lt.s32.totalorder (!%p242_p2), %s1313_s28, 31 }
   0xb   : > { %v312_v0 = vld [vmem:[%s1966_s1] sm:$0x7]  ;;  %vm362_vm0 = vcmask 1042432   ;;  %v534_v1 = vld [vmem:[%s1967_s2 + $0x38] sm:$0xff]  ;;  %v533_v2 = vld [vmem:[%s1967_s2 + $0x30] sm:$0xff]  ;;  %s1974_s28 = smov (!%p279_p3, %s1313_s28), 31 }
   0xc   : > { %1476 = vmatprep.subr.msk.mxu0 %vm362_vm0, %v312_v0  ;;  %1502 = vmatprep.subr.mxu1 %v534_v1  ;;  %v532_v3 = vld [vmem:[%s1967_s2 + $0x28] sm:$0xff]  ;;  %v531_v4 = vld [vmem:[%s1967_s2 + $0x20] sm:$0xff]  ;;  %s1717_s14 = sshll.u32 %s1974_s28, 3  ;;  %vm313_vm1 = vcmask 23552   ;;  %v530_v5 = vld [vmem:[%s1967_s2 + $0x18] sm:$0xff]  ;;  %vm535_vm2 = vcmask 523264  }
   0xd   : > { %1477 = vmatpush3.msk.msra.mxu0 %vm362_vm0, %v312_v0  ;;  %1503 = vmatpush3.msra.mxu1 %v534_v1  ;;  %s1723_s17 = scalar_lea.vmem %s1965_s0, %s1717_s14  ;;  %v529_v22 = vld [vmem:[%s1967_s2 + $0x10] sm:$0xff]  ;;  %v528_v23 = vld [vmem:[%s1967_s2 + $0x8] sm:$0xff]  ;;  %v527_v24 = vld [vmem:[%s1967_s2] sm:$0xff]  ;;  %s1874_s20 = scalar_lea.vmem %s1971_s6, %s1717_s14 }
   0xe   : > { %1504 = vmatprep.subr.mxu1 %v533_v2  ;;  %v296_v6 = vld [vmem:[%s1723_s17] sm:$0xff]  ;;  %v297_v7 = vld [vmem:[%s1723_s17 + $0x8] sm:$0xff]  ;;  %v298_v8 = vld [vmem:[%s1723_s17 + $0x10] sm:$0xff]  ;;  %s1881_s23 = scalar_lea.vmem %s1972_s7, %s1717_s14 }
   0xf   : > { %1505 = vmatpush3.msra.mxu1 %v533_v2  ;;  %1478 = vmatprep.mubr.msk.f32.mxu0 %vm313_vm1, %v296_v6  ;;  %v299_v9 = vld [vmem:[%s1723_s17 + $0x18] sm:$0xff]  ;;  %v300_v10 = vld [vmem:[%s1723_s17 + $0x20] sm:$0xff]  ;;  %v301_v11 = vld [vmem:[%s1723_s17 + $0x28] sm:$0xff] }
  0x10   : > { %1506 = vmatprep.subr.mxu1 %v532_v3  ;;  %1479 = vmatmul.mubr.msk.f32.vlgmr.msra.gmra.mxu0 %vm313_vm1, %v297_v7  ;;  %v302_v12 = vld [vmem:[%s1723_s17 + $0x30] sm:$0xff]  ;;  %v303_v13 = vld [vmem:[%s1723_s17 + $0x38] sm:$0xff]  ;;  %v304_v14 = vld [vmem:[%s1723_s17 + $0x40] sm:$0xff] }
  0x11   : > { %1507 = vmatpush3.msra.mxu1 %v532_v3  ;;  %1481 = vmatprep.mubr.msk.f32.mxu0 %vm313_vm1, %v298_v8  ;;  %v305_v15 = vld [vmem:[%s1723_s17 + $0x48] sm:$0xff]  ;;  %v306_v16 = vld [vmem:[%s1723_s17 + $0x50] sm:$0xff]  ;;  %v307_v17 = vld [vmem:[%s1723_s17 + $0x58] sm:$0xff] }
  0x12   : > { %1508 = vmatprep.subr.mxu1 %v531_v4  ;;  %v308_v18 = vld [vmem:[%s1723_s17 + $0x60] sm:$0xff]  ;;  %v309_v19 = vld [vmem:[%s1723_s17 + $0x68] sm:$0xff]  ;;  %v310_v20 = vld [vmem:[%s1723_s17 + $0x70] sm:$0xff] }
  0x13   : > { %1509 = vmatpush3.msra.mxu1 %v531_v4  ;;  %v311_v21 = vld [vmem:[%s1723_s17 + $0x78] sm:$0xff]  ;;  %v751_v26 = vld [vmem:[%s1968_s3 + $0x30] sm:$0xff]  ;;  %v750_v27 = vld [vmem:[%s1968_s3 + $0x28] sm:$0xff] }
  0x14   : > { %1510 = vmatprep.subr.mxu1 %v530_v5  ;;  %1482 = vmatmul.mubr.msk.f32.gmra.mxu0 %vm313_vm1, %v299_v9  ;;  %v752_v25 = vld [vmem:[%s1968_s3 + $0x38] sm:$0xff]  ;;  %v749_v28 = vld [vmem:[%s1968_s3 + $0x20] sm:$0xff]  ;;  %v747_v30 = vld [vmem:[%s1968_s3 + $0x10] sm:$0xff] }
  0x15   : > { %1511 = vmatpush3.msra.mxu1 %v530_v5  ;;  %1484 = vmatprep.mubr.msk.f32.mxu0 %vm313_vm1, %v300_v10  ;;  %v748_v29 = vld [vmem:[%s1968_s3 + $0x18] sm:$0xff]  ;;  %v746_v31 = vld [vmem:[%s1968_s3 + $0x8] sm:$0xff]  ;;  %v745_v0 = vld [vmem:[%s1968_s3] sm:$0xff] }
  0x16   : > { %1512 = vmatprep.subr.mxu1 %v529_v22  ;;  %1542 = vmatprep.subr.mxu0 %v752_v25  ;;  %v969_v1 = vld [vmem:[%s1969_s4 + $0x38] sm:$0xff]  ;;  %v968_v2 = vld [vmem:[%s1969_s4 + $0x30] sm:$0xff]  ;;  %v967_v3 = vld [vmem:[%s1969_s4 + $0x28] sm:$0xff] }
  0x17   : > { %1513 = vmatpush3.msra.mxu1 %v529_v22  ;;  %1543 = vmatpush3.msra.mxu0 %v752_v25  ;;  %v966_v4 = vld [vmem:[%s1969_s4 + $0x20] sm:$0xff]  ;;  %v965_v5 = vld [vmem:[%s1969_s4 + $0x18] sm:$0xff]  ;;  %v964_v6 = vld [vmem:[%s1969_s4 + $0x10] sm:$0xff] }
  0x18   : > { %1485 = vmatmul.mubr.msk.f32.gmra.mxu0 %vm313_vm1, %v301_v11  ;;  %1514 = vmatprep.subr.mxu1 %v528_v23 }
  0x19   : > { %1487 = vmatprep.mubr.msk.f32.mxu0 %vm313_vm1, %v302_v12  ;;  %1515 = vmatpush3.msra.mxu1 %v528_v23 }
  0x1a   : > { %1516 = vmatprep.subr.mxu1 %v527_v24  ;;  %1544 = vmatprep.subr.mxu0 %v751_v26 }
  0x1b   : > { %1517 = vmatpush3.msra.mxu1 %v527_v24  ;;  %1545 = vmatpush3.msra.mxu0 %v751_v26 }
  0x1c   : > { %1488 = vmatmul.mubr.msk.f32.gmra.mxu0 %vm313_vm1, %v303_v13  ;;  %1546 = vmatprep.subr.mxu0 %v750_v27 }
  0x1d   : > { %1490 = vmatprep.mubr.msk.f32.mxu0 %vm313_vm1, %v304_v14  ;;  %1547 = vmatpush3.msra.mxu0 %v750_v27 }
  0x1e   : > { %1548 = vmatprep.subr.mxu0 %v749_v28  ;;  %1622 = vmatprep.subr.mxu1 %v969_v1 }
  0x1f   : > { %1549 = vmatpush3.msra.mxu0 %v749_v28 }
  0x20   : > { %1491 = vmatmul.mubr.msk.f32.gmra.mxu0 %vm313_vm1, %v305_v15  ;;  %1550 = vmatprep.subr.mxu0 %v748_v29 }
  0x21   : > { %1493 = vmatprep.mubr.msk.f32.mxu0 %vm313_vm1, %v306_v16  ;;  %1551 = vmatpush3.msra.mxu0 %v748_v29 }
  0x22   : > { %1552 = vmatprep.subr.mxu0 %v747_v30 }
  0x23   : > { %1553 = vmatpush3.msra.mxu0 %v747_v30 }
  0x24   : > { %1494 = vmatmul.mubr.msk.f32.gmra.mxu0 %vm313_vm1, %v307_v17  ;;  %1554 = vmatprep.subr.mxu0 %v746_v31 }
  0x25   : > { %1496 = vmatprep.mubr.msk.f32.mxu0 %vm313_vm1, %v308_v18  ;;  %1555 = vmatpush3.msra.mxu0 %v746_v31 }
  0x26   : > { %1556 = vmatprep.subr.mxu0 %v745_v0 }
  0x27   : > { %1557 = vmatpush3.msra.mxu0 %v745_v0 }
  0x28   : > { %1497 = vmatmul.mubr.msk.f32.gmra.mxu0 %vm313_vm1, %v309_v19  ;;  %1582 = vmatprep.subr.mxu0 %v969_v1 }
  0x29   : > { %1499 = vmatprep.mubr.msk.f32.mxu0 %vm313_vm1, %v310_v20 }
  0x2c   : > { %1500 = vmatmul.mubr.msk.f32.gmra.mxu0 %vm313_vm1, %v311_v21 }
  0xd0   : > { %v1480_v32 = vpop.f32.mrf.mxu0 }
  0xd1   : > { %v512_v35 = vmax.f32 %v1480_v32, 0.0 }
  0xd2   : > { %v432_v33 = vpop.f32.mrf.mxu0 }
  0xd3   : > { %v511_v34 = vmax.f32 %v432_v33, 0.0 }
  0xd4   : > { %v1483_v36 = vpop.f32.mrf.mxu0 }
  0xd5   : > { %1518 = vmatprep.mubr.msk.f32.mxu1 %vm535_vm2, %v511_v34  ;;  %v514_v39 = vmax.f32 %v1483_v36, 0.0 }
  0xd6   : > { %v442_v37 = vpop.f32.mrf.mxu0  ;;  %1519 = vmatmul.mubr.msk.f32.vlgmr.msra.gmra.mxu1 %vm535_vm2, %v512_v35 }
  0xd7   : > { %v513_v38 = vmax.f32 %v442_v37, 0.0  ;;  %1630 = vmatpush3.msra.mxu1 %v969_v1 }
  0xd8   : > { %v1486_v40 = vpop.f32.mrf.mxu0  ;;  %1623 = vmatprep.subr.mxu1 %v968_v2 }
  0xd9   : > { %1521 = vmatprep.mubr.msk.f32.mxu1 %vm535_vm2, %v513_v38  ;;  %v516_v43 = vmax.f32 %v1486_v40, 0.0  ;;  %1631 = vmatpush3.msra.mxu1 %v968_v2  ;;  %v962_v40 = vld [vmem:[%s1969_s4] sm:$0xff] }
  0xda   : > { %v452_v41 = vpop.f32.mrf.mxu0  ;;  %1522 = vmatmul.mubr.msk.f32.gmra.mxu1 %vm535_vm2, %v514_v39  ;;  %1624 = vmatprep.subr.mxu1 %v967_v3  ;;  %v963_v39 = vld [vmem:[%s1969_s4 + $0x8] sm:$0xff] }
  0xdb   : > { %v515_v42 = vmax.f32 %v452_v41, 0.0  ;;  %1632 = vmatpush3.msra.mxu1 %v967_v3 }
  0xdc   : > { %v1489_v44 = vpop.f32.mrf.mxu0  ;;  %1625 = vmatprep.subr.mxu1 %v966_v4 }
  0xdd   : > { %1524 = vmatprep.mubr.msk.f32.mxu1 %vm535_vm2, %v515_v42  ;;  %v518_v47 = vmax.f32 %v1489_v44, 0.0  ;;  %1633 = vmatpush3.msra.mxu1 %v966_v4 }
  0xde   : > { %v462_v45 = vpop.f32.mrf.mxu0  ;;  %1525 = vmatmul.mubr.msk.f32.gmra.mxu1 %vm535_vm2, %v516_v43  ;;  %1626 = vmatprep.subr.mxu1 %v965_v5 }
  0xdf   : > { %v517_v46 = vmax.f32 %v462_v45, 0.0  ;;  %1634 = vmatpush3.msra.mxu1 %v965_v5 }
  0xe0   : > { %v1492_v48 = vpop.f32.mrf.mxu0  ;;  %1627 = vmatprep.subr.mxu1 %v964_v6 }
  0xe1   : > { %1527 = vmatprep.mubr.msk.f32.mxu1 %vm535_vm2, %v517_v46  ;;  %v520_v51 = vmax.f32 %v1492_v48, 0.0  ;;  %1635 = vmatpush3.msra.mxu1 %v964_v6 }
  0xe2   : > { %v472_v49 = vpop.f32.mrf.mxu0  ;;  %1528 = vmatmul.mubr.msk.f32.gmra.mxu1 %vm535_vm2, %v518_v47  ;;  %1628 = vmatprep.subr.mxu1 %v963_v39 }
  0xe3   : > { %v519_v50 = vmax.f32 %v472_v49, 0.0  ;;  %1636 = vmatpush3.msra.mxu1 %v963_v39 }
  0xe4   : > { %v1495_v52 = vpop.f32.mrf.mxu0  ;;  %1629 = vmatprep.subr.mxu1 %v962_v40 }
  0xe5   : > { %1530 = vmatprep.mubr.msk.f32.mxu1 %vm535_vm2, %v519_v50  ;;  %v522_v55 = vmax.f32 %v1495_v52, 0.0  ;;  %1637 = vmatpush3.msra.mxu1 %v962_v40 }
  0xe6   : > { %v482_v53 = vpop.f32.mrf.mxu0  ;;  %1531 = vmatmul.mubr.msk.f32.gmra.mxu1 %vm535_vm2, %v520_v51 }
  0xe7   : > { %v521_v54 = vmax.f32 %v482_v53, 0.0 }
  0xe8   : > { %v1498_v56 = vpop.f32.mrf.mxu0 }
  0xe9   : > { %1533 = vmatprep.mubr.msk.f32.mxu1 %vm535_vm2, %v521_v54  ;;  %v524_v59 = vmax.f32 %v1498_v56, 0.0 }
  0xea   : > { %v492_v57 = vpop.f32.mrf.mxu0  ;;  %1534 = vmatmul.mubr.msk.f32.gmra.mxu1 %vm535_vm2, %v522_v55 }
  0xeb   : > { %v523_v58 = vmax.f32 %v492_v57, 0.0 }
  0xec   : > { %v1501_v60 = vpop.f32.mrf.mxu0 }
  0xed   : > { %1536 = vmatprep.mubr.msk.f32.mxu1 %vm535_vm2, %v523_v58  ;;  %v526_v63 = vmax.f32 %v1501_v60, 0.0 }
  0xee   : > { %v502_v61 = vpop.f32.mrf.mxu0  ;;  %1537 = vmatmul.mubr.msk.f32.gmra.mxu1 %vm535_vm2, %v524_v59 }
  0xef   : > { %v525_v62 = vmax.f32 %v502_v61, 0.0 }
  0xf1   : > { %1539 = vmatprep.mubr.msk.f32.mxu1 %vm535_vm2, %v525_v62 }
  0xf2   : > { %1540 = vmatmul.mubr.msk.f32.gmra.mxu1 %vm535_vm2, %v526_v63 }
 0x196   : > { %v1520_v7 = vpop.f32.mrf.mxu1 }
 0x197   : > { %v730_v10 = vmax.f32 %v1520_v7, 0.0 }
 0x198   : > { %v650_v8 = vpop.f32.mrf.mxu1 }
 0x199   : > { %v729_v9 = vmax.f32 %v650_v8, 0.0 }
 0x19a   : > { %v1523_v11 = vpop.f32.mrf.mxu1 }
 0x19b   : > { %1558 = vmatprep.mubr.msk.f32.mxu0 %vm535_vm2, %v729_v9  ;;  %v732_v14 = vmax.f32 %v1523_v11, 0.0  ;;  %v1868_v9 = vld [vmem:[%s1970_s5] ss:$0 sm:$0xff] }
 0x19c   : > { %v660_v12 = vpop.f32.mrf.mxu1  ;;  %1559 = vmatmul.mubr.msk.f32.vlgmr.msra.gmra.mxu0 %vm535_vm2, %v730_v10 }
 0x19d   : > { %v731_v13 = vmax.f32 %v660_v12, 0.0  ;;  %1583 = vmatpush3.msra.mxu0 %v969_v1 }
 0x19e   : > { %v1526_v15 = vpop.f32.mrf.mxu1  ;;  %1584 = vmatprep.subr.mxu0 %v968_v2 }
 0x19f   : > { %1561 = vmatprep.mubr.msk.f32.mxu0 %vm535_vm2, %v731_v13  ;;  %1585 = vmatpush3.msra.mxu0 %v968_v2  ;;  %v734_v18 = vmax.f32 %v1526_v15, 0.0 }
 0x1a0   : > { %v670_v16 = vpop.f32.mrf.mxu1  ;;  %1562 = vmatmul.mubr.msk.f32.gmra.mxu0 %vm535_vm2, %v732_v14  ;;  %1586 = vmatprep.subr.mxu0 %v967_v3 }
 0x1a1   : > { %v733_v17 = vmax.f32 %v670_v16, 0.0  ;;  %1587 = vmatpush3.msra.mxu0 %v967_v3 }
 0x1a2   : > { %v1529_v19 = vpop.f32.mrf.mxu1  ;;  %1588 = vmatprep.subr.mxu0 %v966_v4 }
 0x1a3   : > { %1564 = vmatprep.mubr.msk.f32.mxu0 %vm535_vm2, %v733_v17  ;;  %1589 = vmatpush3.msra.mxu0 %v966_v4  ;;  %v736_v22 = vmax.f32 %v1529_v19, 0.0 }
 0x1a4   : > { %v680_v20 = vpop.f32.mrf.mxu1  ;;  %1565 = vmatmul.mubr.msk.f32.gmra.mxu0 %vm535_vm2, %v734_v18  ;;  %1590 = vmatprep.subr.mxu0 %v965_v5 }
 0x1a5   : > { %v735_v21 = vmax.f32 %v680_v20, 0.0  ;;  %1591 = vmatpush3.msra.mxu0 %v965_v5 }
 0x1a6   : > { %v1532_v23 = vpop.f32.mrf.mxu1  ;;  %1592 = vmatprep.subr.mxu0 %v964_v6 }
 0x1a7   : > { %1567 = vmatprep.mubr.msk.f32.mxu0 %vm535_vm2, %v735_v21  ;;  %1593 = vmatpush3.msra.mxu0 %v964_v6  ;;  %v738_v26 = vmax.f32 %v1532_v23, 0.0 }
 0x1a8   : > { %v690_v24 = vpop.f32.mrf.mxu1  ;;  %1568 = vmatmul.mubr.msk.f32.gmra.mxu0 %vm535_vm2, %v736_v22  ;;  %1594 = vmatprep.subr.mxu0 %v963_v39 }
 0x1a9   : > { %v737_v25 = vmax.f32 %v690_v24, 0.0  ;;  %1595 = vmatpush3.msra.mxu0 %v963_v39 }
 0x1aa   : > { %v1535_v27 = vpop.f32.mrf.mxu1  ;;  %1596 = vmatprep.subr.mxu0 %v962_v40 }
 0x1ab   : > { %1570 = vmatprep.mubr.msk.f32.mxu0 %vm535_vm2, %v737_v25  ;;  %v740_v30 = vmax.f32 %v1535_v27, 0.0  ;;  %1597 = vmatpush3.msra.mxu0 %v962_v40 }
 0x1ac   : > { %v700_v28 = vpop.f32.mrf.mxu1  ;;  %1571 = vmatmul.mubr.msk.f32.gmra.mxu0 %vm535_vm2, %v738_v26 }
 0x1ad   : > { %v739_v29 = vmax.f32 %v700_v28, 0.0 }
 0x1ae   : > { %v1538_v31 = vpop.f32.mrf.mxu1 }
 0x1af   : > { %1573 = vmatprep.mubr.msk.f32.mxu0 %vm535_vm2, %v739_v29  ;;  %v742_v34 = vmax.f32 %v1538_v31, 0.0 }
 0x1b0   : > { %v710_v32 = vpop.f32.mrf.mxu1  ;;  %1574 = vmatmul.mubr.msk.f32.gmra.mxu0 %vm535_vm2, %v740_v30 }
 0x1b1   : > { %v741_v33 = vmax.f32 %v710_v32, 0.0 }
 0x1b2   : > { %v1541_v35 = vpop.f32.mrf.mxu1 }
 0x1b3   : > { %1576 = vmatprep.mubr.msk.f32.mxu0 %vm535_vm2, %v741_v33  ;;  %v744_v38 = vmax.f32 %v1541_v35, 0.0 }
 0x1b4   : > { %v720_v36 = vpop.f32.mrf.mxu1  ;;  %1577 = vmatmul.mubr.msk.f32.gmra.mxu0 %vm535_vm2, %v742_v34 }
 0x1b5   : > { %v743_v37 = vmax.f32 %v720_v36, 0.0 }
 0x1b7   : > { %1579 = vmatprep.mubr.msk.f32.mxu0 %vm535_vm2, %v743_v37 }
 0x1b8   : > { %1580 = vmatmul.mubr.msk.f32.gmra.mxu0 %vm535_vm2, %v744_v38 }
 0x25c   : > { %v1560_v41 = vpop.f32.mrf.mxu0 }
 0x25d   : > { %v947_v44 = vmax.f32 %v1560_v41, 0.0 }
 0x25e   : > { %v867_v42 = vpop.f32.mrf.mxu0 }
 0x25f   : > { %v946_v43 = vmax.f32 %v867_v42, 0.0 }
 0x260   : > { %v1563_v45 = vpop.f32.mrf.mxu0 }
 0x261   : > { %1598 = vmatprep.mubr.msk.f32.mxu0 %vm535_vm2, %v946_v43  ;;  %v949_v48 = vmax.f32 %v1563_v45, 0.0 }
 0x262   : > { %v877_v46 = vpop.f32.mrf.mxu0  ;;  %1599 = vmatmul.mubr.msk.f32.vlgmr.msra.gmra.mxu0 %vm535_vm2, %v947_v44 }
 0x263   : > { %v948_v47 = vmax.f32 %v877_v46, 0.0 }
 0x264   : > { %v1566_v49 = vpop.f32.mrf.mxu0 }
 0x265   : > { %1601 = vmatprep.mubr.msk.f32.mxu1 %vm535_vm2, %v948_v47  ;;  %v951_v52 = vmax.f32 %v1566_v49, 0.0 }
 0x266   : > { %v887_v50 = vpop.f32.mrf.mxu0  ;;  %1602 = vmatmul.mubr.msk.f32.vlgmr.msra.gmra.mxu1 %vm535_vm2, %v949_v48 }
 0x267   : > { %v950_v51 = vmax.f32 %v887_v50, 0.0 }
 0x268   : > { %v1569_v53 = vpop.f32.mrf.mxu0 }
 0x269   : > { %1604 = vmatprep.mubr.msk.f32.mxu1 %vm535_vm2, %v950_v51  ;;  %v953_v56 = vmax.f32 %v1569_v53, 0.0 }
 0x26a   : > { %v897_v54 = vpop.f32.mrf.mxu0  ;;  %1605 = vmatmul.mubr.msk.f32.gmra.mxu1 %vm535_vm2, %v951_v52 }
 0x26b   : > { %v952_v55 = vmax.f32 %v897_v54, 0.0 }
 0x26c   : > { %v1572_v57 = vpop.f32.mrf.mxu0 }
 0x26d   : > { %1607 = vmatprep.mubr.msk.f32.mxu1 %vm535_vm2, %v952_v55  ;;  %v955_v60 = vmax.f32 %v1572_v57, 0.0 }
 0x26e   : > { %v907_v58 = vpop.f32.mrf.mxu0  ;;  %1608 = vmatmul.mubr.msk.f32.gmra.mxu1 %vm535_vm2, %v953_v56 }
 0x26f   : > { %v954_v59 = vmax.f32 %v907_v58, 0.0 }
 0x270   : > { %v1575_v61 = vpop.f32.mrf.mxu0 }
 0x271   : > { %1610 = vmatprep.mubr.msk.f32.mxu1 %vm535_vm2, %v954_v59  ;;  %v957_v0 = vmax.f32 %v1575_v61, 0.0 }
 0x272   : > { %v917_v62 = vpop.f32.mrf.mxu0  ;;  %1611 = vmatmul.mubr.msk.f32.gmra.mxu1 %vm535_vm2, %v955_v60 }
 0x273   : > { %v956_v63 = vmax.f32 %v917_v62, 0.0 }
 0x274   : > { %v1578_v1 = vpop.f32.mrf.mxu0 }
 0x275   : > { %1613 = vmatprep.mubr.msk.f32.mxu1 %vm535_vm2, %v956_v63  ;;  %v959_v4 = vmax.f32 %v1578_v1, 0.0 }
 0x276   : > { %v927_v2 = vpop.f32.mrf.mxu0  ;;  %1614 = vmatmul.mubr.msk.f32.gmra.mxu1 %vm535_vm2, %v957_v0 }
 0x277   : > { %v958_v3 = vmax.f32 %v927_v2, 0.0 }
 0x278   : > { %v1581_v5 = vpop.f32.mrf.mxu0 }
 0x279   : > { %1616 = vmatprep.mubr.msk.f32.mxu1 %vm535_vm2, %v958_v3  ;;  %v961_v8 = vmax.f32 %v1581_v5, 0.0 }
 0x27a   : > { %v937_v6 = vpop.f32.mrf.mxu0  ;;  %1617 = vmatmul.mubr.msk.f32.gmra.mxu1 %vm535_vm2, %v959_v4 }
 0x27b   : > { %v960_v7 = vmax.f32 %v937_v6, 0.0 }
 0x27d   : > { %1619 = vmatprep.mubr.msk.f32.mxu1 %vm535_vm2, %v960_v7 }
 0x27e   : > { %1620 = vmatmul.mubr.msk.f32.gmra.mxu1 %vm535_vm2, %v961_v8 }
 0x322   : > { %v1600_v10 = vpop.f32.mrf.mxu0 }
 0x323   : > { %v1097_v11 = vadd.f32 %v1600_v10, %v1868_v9 }
 0x324   : > { %v1091_v12 = vpop.f32.mrf.mxu0 }
 0x325   : > { %1171 = vst.msk [vmem:[%s1874_s20 + $0x8] sm:$0xff] %vm313_vm1, %v1097_v11  ;;  %v1187_v13 = vmul.f32 0.0, %v1097_v11  ;;  %v1092_v14 = vadd.f32 %v1868_v9, %v1091_v12 }
 0x326   : > { %v1603_v15 = vpop.f32.mrf.mxu1 }
 0x327   : > { %1203 = vst.msk [vmem:[%s1881_s23 + $0x8] sm:$0xff] %vm313_vm1, %v1187_v13  ;;  %1170 = vst.msk [vmem:[%s1874_s20] sm:$0xff] %vm313_vm1, %v1092_v14  ;;  %v1186_v16 = vmul.f32 0.0, %v1092_v14  ;;  %v1107_v17 = vadd.f32 %v1603_v15, %v1868_v9 }
 0x328   : > { %v1101_v18 = vpop.f32.mrf.mxu1 }
 0x329   : > { %1202 = vst.msk [vmem:[%s1881_s23] sm:$0xff] %vm313_vm1, %v1186_v16  ;;  %1173 = vst.msk [vmem:[%s1874_s20 + $0x18] sm:$0xff] %vm313_vm1, %v1107_v17  ;;  %v1189_v19 = vmul.f32 0.0, %v1107_v17  ;;  %v1102_v20 = vadd.f32 %v1868_v9, %v1101_v18 }
 0x32a   : > { %v1606_v21 = vpop.f32.mrf.mxu1 }
 0x32b   : > { %1205 = vst.msk [vmem:[%s1881_s23 + $0x18] sm:$0xff] %vm313_vm1, %v1189_v19  ;;  %1172 = vst.msk [vmem:[%s1874_s20 + $0x10] sm:$0xff] %vm313_vm1, %v1102_v20  ;;  %v1188_v22 = vmul.f32 0.0, %v1102_v20  ;;  %v1117_v23 = vadd.f32 %v1606_v21, %v1868_v9 }
 0x32c   : > { %v1111_v24 = vpop.f32.mrf.mxu1 }
 0x32d   : > { %1204 = vst.msk [vmem:[%s1881_s23 + $0x10] sm:$0xff] %vm313_vm1, %v1188_v22  ;;  %1175 = vst.msk [vmem:[%s1874_s20 + $0x28] sm:$0xff] %vm313_vm1, %v1117_v23  ;;  %v1191_v25 = vmul.f32 0.0, %v1117_v23  ;;  %v1112_v26 = vadd.f32 %v1868_v9, %v1111_v24 }
 0x32e   : > { %v1609_v27 = vpop.f32.mrf.mxu1 }
 0x32f   : > { %1207 = vst.msk [vmem:[%s1881_s23 + $0x28] sm:$0xff] %vm313_vm1, %v1191_v25  ;;  %1174 = vst.msk [vmem:[%s1874_s20 + $0x20] sm:$0xff] %vm313_vm1, %v1112_v26  ;;  %v1190_v28 = vmul.f32 0.0, %v1112_v26  ;;  %v1127_v29 = vadd.f32 %v1609_v27, %v1868_v9 }
 0x330   : > { %v1121_v30 = vpop.f32.mrf.mxu1 }
 0x331   : > { %1206 = vst.msk [vmem:[%s1881_s23 + $0x20] sm:$0xff] %vm313_vm1, %v1190_v28  ;;  %1177 = vst.msk [vmem:[%s1874_s20 + $0x38] sm:$0xff] %vm313_vm1, %v1127_v29  ;;  %v1193_v31 = vmul.f32 0.0, %v1127_v29  ;;  %v1122_v32 = vadd.f32 %v1868_v9, %v1121_v30 }
 0x332   : > { %v1612_v33 = vpop.f32.mrf.mxu1 }
 0x333   : > { %1209 = vst.msk [vmem:[%s1881_s23 + $0x38] sm:$0xff] %vm313_vm1, %v1193_v31  ;;  %1176 = vst.msk [vmem:[%s1874_s20 + $0x30] sm:$0xff] %vm313_vm1, %v1122_v32  ;;  %v1192_v34 = vmul.f32 0.0, %v1122_v32  ;;  %v1137_v35 = vadd.f32 %v1612_v33, %v1868_v9 }
 0x334   : > { %v1131_v36 = vpop.f32.mrf.mxu1 }
 0x335   : > { %1208 = vst.msk [vmem:[%s1881_s23 + $0x30] sm:$0xff] %vm313_vm1, %v1192_v34  ;;  %1179 = vst.msk [vmem:[%s1874_s20 + $0x48] sm:$0xff] %vm313_vm1, %v1137_v35  ;;  %v1195_v37 = vmul.f32 0.0, %v1137_v35  ;;  %v1132_v38 = vadd.f32 %v1868_v9, %v1131_v36 }
 0x336   : > { %v1615_v39 = vpop.f32.mrf.mxu1 }
 0x337   : > { %1211 = vst.msk [vmem:[%s1881_s23 + $0x48] sm:$0xff] %vm313_vm1, %v1195_v37  ;;  %1178 = vst.msk [vmem:[%s1874_s20 + $0x40] sm:$0xff] %vm313_vm1, %v1132_v38  ;;  %v1194_v40 = vmul.f32 0.0, %v1132_v38  ;;  %v1147_v41 = vadd.f32 %v1615_v39, %v1868_v9 }
 0x338   : > { %v1141_v42 = vpop.f32.mrf.mxu1 }
 0x339   : > { %1210 = vst.msk [vmem:[%s1881_s23 + $0x40] sm:$0xff] %vm313_vm1, %v1194_v40  ;;  %1181 = vst.msk [vmem:[%s1874_s20 + $0x58] sm:$0xff] %vm313_vm1, %v1147_v41  ;;  %v1197_v43 = vmul.f32 0.0, %v1147_v41  ;;  %v1142_v44 = vadd.f32 %v1868_v9, %v1141_v42 }
 0x33a   : > { %v1618_v45 = vpop.f32.mrf.mxu1 }
 0x33b   : > { %1213 = vst.msk [vmem:[%s1881_s23 + $0x58] sm:$0xff] %vm313_vm1, %v1197_v43  ;;  %1180 = vst.msk [vmem:[%s1874_s20 + $0x50] sm:$0xff] %vm313_vm1, %v1142_v44  ;;  %v1196_v46 = vmul.f32 0.0, %v1142_v44  ;;  %v1157_v47 = vadd.f32 %v1618_v45, %v1868_v9 }
 0x33c   : > { %v1151_v48 = vpop.f32.mrf.mxu1 }
 0x33d   : > { %1212 = vst.msk [vmem:[%s1881_s23 + $0x50] sm:$0xff] %vm313_vm1, %v1196_v46  ;;  %1183 = vst.msk [vmem:[%s1874_s20 + $0x68] sm:$0xff] %vm313_vm1, %v1157_v47  ;;  %v1199_v49 = vmul.f32 0.0, %v1157_v47  ;;  %v1152_v50 = vadd.f32 %v1868_v9, %v1151_v48 }
 0x33e   : > { %v1621_v51 = vpop.f32.mrf.mxu1 }
 0x33f   : > { %1215 = vst.msk [vmem:[%s1881_s23 + $0x68] sm:$0xff] %vm313_vm1, %v1199_v49  ;;  %1182 = vst.msk [vmem:[%s1874_s20 + $0x60] sm:$0xff] %vm313_vm1, %v1152_v50  ;;  %v1198_v52 = vmul.f32 0.0, %v1152_v50  ;;  %v1167_v53 = vadd.f32 %v1621_v51, %v1868_v9 }
 0x340   : > { %v1161_v54 = vpop.f32.mrf.mxu1 }
 0x341   : > { %1214 = vst.msk [vmem:[%s1881_s23 + $0x60] sm:$0xff] %vm313_vm1, %v1198_v52  ;;  %1185 = vst.msk [vmem:[%s1874_s20 + $0x78] sm:$0xff] %vm313_vm1, %v1167_v53  ;;  %v1201_v55 = vmul.f32 0.0, %v1167_v53  ;;  %v1162_v56 = vadd.f32 %v1868_v9, %v1161_v54 }
 0x343   : > { %1217 = vst.msk [vmem:[%s1881_s23 + $0x78] sm:$0xff] %vm313_vm1, %v1201_v55  ;;  %1184 = vst.msk [vmem:[%s1874_s20 + $0x70] sm:$0xff] %vm313_vm1, %v1162_v56  ;;  %v1200_v57 = vmul.f32 0.0, %v1162_v56 }
 0x345   : > { %1216 = vst.msk [vmem:[%s1881_s23 + $0x70] sm:$0xff] %vm313_vm1, %v1200_v57 }
 0x346 PF: > { %s18_s24 = sadd.s32 1, %s1652_s24  }
 0x347   : > { %p15_p4 = scmp.ge.s32.totalorder %s18_s24, 4  }
 0x349   :  { %17 = sbr.rel (!%p15_p4) target bundleno = 1 (0x1), region = 86 }

</bundles_post_ra>
